<compile_context>
chip_gen: v7x
topology: tpu7x:2x2x1
jax: 0.10.0
libtpu: 0.0.40
codegen_flags: <defaults>
</compile_context>

<pallas_src>
import jax
import jax.numpy as jnp
from jax.experimental import pallas as pl
from jax.experimental.pallas import tpu as pltpu


def _round_up(x: int, m: int) -> int:
    return ((x + m - 1) // m) * m


def _full_kernel(x_ref, w_ref, b_ref, o_ref, acc_ref):
    """One (tm, tn) output tile; K reduction over grid axis 2.

    x_ref : (tm, tk)   activations
    w_ref : (tn, tk)   weight in native nn.Linear (N_out, N_in) layout
    b_ref : (1,  tn)   bias
    o_ref : (tm, tn)   output
    acc_ref: (tm, tn)  f32 accumulator (VMEM scratch, resident across K)
    """
    k = pl.program_id(2)

    @pl.when(k == 0)
    def _():
        acc_ref[...] = jnp.zeros_like(acc_ref)

    # Contract last dim of x with last dim of w (== x @ w.T) on the MXU,
    # accumulating in f32.
    acc_ref[...] += jax.lax.dot_general(
        x_ref[...], w_ref[...],
        dimension_numbers=(((1,), (1,)), ((), ())),
        preferred_element_type=jnp.float32,
    )

    @pl.when(k == pl.num_programs(2) - 1)
    def _():
        y = acc_ref[...] + b_ref[...]           # (tm, tn) + (1, tn) broadcast, f32
        y = jnp.where(y >= 0, y, 0.1 * y)       # LeakyReLU(0.1), f32 epilogue
        o_ref[...] = y.astype(o_ref.dtype)


def full_forward(x, weight, bias, drop_out: bool = False, compute_dtype=None):
    """Pallas equivalent of Full.forward (inference).

    x:      (B, N_in)     float32
    weight: (N_out, N_in) float32   (native PyTorch nn.Linear layout; NOT transposed)
    bias:   (N_out,)      float32
    compute_dtype: optionally jnp.bfloat16 to cast matmul operands (f32 accumulation
                   and f32 epilogue are kept); default None = keep input dtype.
    """
    # TODO(synk): training-mode Dropout(0.5) not implemented (eval-mode identity);
    # could be added in-kernel with pltpu.prng_seed / pltpu.prng_random_bits.
    del drop_out

    B, N_in = x.shape
    N_out = weight.shape[0]
    out_dtype = x.dtype

    cdt = compute_dtype if compute_dtype is not None else x.dtype
    if x.dtype != cdt:
        x = x.astype(cdt)
    if weight.dtype != cdt:
        weight = weight.astype(cdt)

    # ---- tile sizes (lane-dense: N/K multiples of 128, M multiple of 8) ----
    tm = min(_round_up(B, 8), 256)
    tn = min(_round_up(N_out, 128), 512)
    tk = min(_round_up(N_in, 128), 512)

    # ---- pad operands to tile multiples (zero padding is exact for matmul) ----
    Mp = _round_up(B, tm)
    Np = _round_up(N_out, tn)
    Kp = _round_up(N_in, tk)

    if (Mp, Kp) != (B, N_in):
        x = jnp.pad(x, ((0, Mp - B), (0, Kp - N_in)))
    if (Np, Kp) != (N_out, N_in):
        weight = jnp.pad(weight, ((0, Np - N_out), (0, Kp - N_in)))
    b2 = bias.astype(jnp.float32).reshape(1, N_out)
    if Np != N_out:
        b2 = jnp.pad(b2, ((0, 0), (0, Np - N_out)))

    grid = (Mp // tm, Np // tn, Kp // tk)

    # ---- VMEM budget (double-buffered inputs + output + f32 accumulator) ----
    in_bytes = jnp.dtype(cdt).itemsize
    out_bytes = jnp.dtype(out_dtype).itemsize
    tile_bytes = (
        2 * (tm * tk + tn * tk + tn) * in_bytes   # double-buffered x, w, bias
        + 2 * (tm * tn) * out_bytes               # double-buffered output
        + (tm * tn) * 4                           # f32 accumulator scratch
    )
    vmem_limit = int(min(max(2 * tile_bytes, 16 << 20), 64 << 20))

    out_padded = pl.pallas_call(
        _full_kernel,
        out_shape=jax.ShapeDtypeStruct((Mp, Np), out_dtype),
        grid_spec=pltpu.PrefetchScalarGridSpec(
            num_scalar_prefetch=0,
            grid=grid,
            in_specs=[
                pl.BlockSpec((tm, tk), lambda i, j, k: (i, k)),   # x
                pl.BlockSpec((tn, tk), lambda i, j, k: (j, k)),   # weight (N_out, N_in)
                pl.BlockSpec((1, tn), lambda i, j, k: (0, j)),    # bias
            ],
            out_specs=pl.BlockSpec((tm, tn), lambda i, j, k: (i, j)),
            scratch_shapes=[pltpu.VMEM((tm, tn), jnp.float32)],
        ),
        compiler_params=pltpu.CompilerParams(
            dimension_semantics=("parallel", "parallel", "arbitrary"),
            vmem_limit_bytes=vmem_limit,
        ),
    )(x, weight, b2)

    if (Mp, Np) != (B, N_out):
        out_padded = out_padded[:B, :N_out]
    return out_padded


def _reference(x, weight, bias):
    y = x @ weight.T + bias
    return jnp.where(y >= 0, y, 0.1 * y)


if __name__ == "__main__":
    key = jax.random.PRNGKey(0)

    # ---- shipped shapes: Full(N_in=32, N_out=64), batch=8 ----
    B, N_in, N_out = 8, 32, 64
    kx, kw, kb = jax.random.split(key, 3)
    bound = 1.0 / (N_in ** 0.5)
    weight = jax.random.uniform(kw, (N_out, N_in), jnp.float32, -bound, bound)
    bias = jax.random.uniform(kb, (N_out,), jnp.float32, -bound, bound)
    x = jax.random.normal(kx, (B, N_in), jnp.float32)

    out = full_forward(x, weight, bias, drop_out=False)
    out = jax.block_until_ready(out)
    ref = _reference(x, weight, bias)
    assert out.shape == (B, N_out)
    assert jnp.allclose(out, ref, atol=1e-5, rtol=1e-5), "mismatch vs reference (small)"

    # ---- second sanity check: non-aligned shapes exercise padding + tiling ----
    B2, N_in2, N_out2 = 40, 200, 300
    k2x, k2w, k2b = jax.random.split(jax.random.PRNGKey(1), 3)
    bound2 = 1.0 / (N_in2 ** 0.5)
    weight2 = jax.random.uniform(k2w, (N_out2, N_in2), jnp.float32, -bound2, bound2)
    bias2 = jax.random.uniform(k2b, (N_out2,), jnp.float32, -bound2, bound2)
    x2 = jax.random.normal(k2x, (B2, N_in2), jnp.float32)

    out2 = jax.block_until_ready(full_forward(x2, weight2, bias2))
    ref2 = _reference(x2, weight2, bias2)
    assert out2.shape == (B2, N_out2)
    assert jnp.allclose(out2, ref2, atol=1e-5, rtol=1e-5), "mismatch vs reference (padded)"

    print("KERNEL_OK")
</pallas_src>

<mosaic_0001>
module attributes {stable_mosaic.version = 11 : i64} {
  func.func @_full_kernel(%arg0: i32, %arg1: i32, %arg2: i32, %arg3: memref<8x128xf32, #tpu.memory_space<vmem>>, %arg4: memref<128x128xf32, #tpu.memory_space<vmem>>, %arg5: memref<1x128xf32, #tpu.memory_space<vmem>>, %arg6: memref<8x128xf32, #tpu.memory_space<vmem>>, %arg7: memref<8x128xf32, #tpu.memory_space<vmem>>) attributes {dimension_semantics = [#tpu.dimension_semantics<parallel>, #tpu.dimension_semantics<parallel>, #tpu.dimension_semantics<arbitrary>], iteration_bounds = array<i64: 1, 1, 1>, scalar_prefetch = 0 : i64, scratch_operands = 1 : i64, tpu.core_type = #tpu.core_type<tc>, window_params = [{transform_indices = @transform_0, window_bounds = array<i64: 8, 128>}, {transform_indices = @transform_1, window_bounds = array<i64: 128, 128>}, {transform_indices = @transform_2, window_bounds = array<i64: 1, 128>}, {transform_indices = @transform_3, window_bounds = array<i64: 8, 128>}]} {
    %c0_i32 = arith.constant 0 : i32
    %0 = arith.cmpi eq, %arg2, %c0_i32 : i32
    %1 = arith.extui %0 : i1 to i32
    %c0_i32_0 = arith.constant 0 : i32
    %2 = arith.cmpi ne, %1, %c0_i32_0 : i32
    scf.if %2 {
      %cst_10 = arith.constant 0.000000e+00 : f32
      %12 = vector.broadcast %cst_10 : f32 to vector<8x128xf32>
      %c0_11 = arith.constant 0 : index
      %c0_12 = arith.constant 0 : index
      %13 = vector.load %arg7[%c0_11, %c0_12] : memref<8x128xf32, #tpu.memory_space<vmem>>, vector<8x128xf32>
      tpu.vector_store %arg7[%c0_11, %c0_12], %12 {strides = array<i32>} : memref<8x128xf32, #tpu.memory_space<vmem>>, vector<8x128xf32>,
    } else {
    }
    %c0 = arith.constant 0 : index
    %c0_1 = arith.constant 0 : index
    %3 = vector.load %arg7[%c0, %c0_1] : memref<8x128xf32, #tpu.memory_space<vmem>>, vector<8x128xf32>
    %c0_2 = arith.constant 0 : index
    %c0_3 = arith.constant 0 : index
    %4 = vector.load %arg3[%c0_2, %c0_3] : memref<8x128xf32, #tpu.memory_space<vmem>>, vector<8x128xf32>
    %c0_4 = arith.constant 0 : index
    %c0_5 = arith.constant 0 : index
    %5 = vector.load %arg4[%c0_4, %c0_5] : memref<128x128xf32, #tpu.memory_space<vmem>>, vector<128x128xf32>
    %cst = arith.constant dense<0.000000e+00> : vector<8x128xf32>
    %6 = tpu.matmul %4, %5, %cst {dimension_numbers = #tpu.dot_dimension_numbers<[1], [1], [0], [0], [0, 0, 1, 0], [], []>} : vector<8x128xf32>, vector<128x128xf32>, vector<8x128xf32> -> vector<8x128xf32>
    %7 = arith.addf %3, %6 : vector<8x128xf32>
    %c0_6 = arith.constant 0 : index
    %c0_7 = arith.constant 0 : index
    %8 = vector.load %arg7[%c0_6, %c0_7] : memref<8x128xf32, #tpu.memory_space<vmem>>, vector<8x128xf32>
    tpu.vector_store %arg7[%c0_6, %c0_7], %7 {strides = array<i32>} : memref<8x128xf32, #tpu.memory_space<vmem>>, vector<8x128xf32>,
    %c0_i32_8 = arith.constant 0 : i32
    %9 = arith.cmpi eq, %arg2, %c0_i32_8 : i32
    %10 = arith.extui %9 : i1 to i32
    %c0_i32_9 = arith.constant 0 : i32
    %11 = arith.cmpi ne, %10, %c0_i32_9 : i32
    scf.if %11 {
      %c0_10 = arith.constant 0 : index
      %c0_11 = arith.constant 0 : index
      %12 = vector.load %arg7[%c0_10, %c0_11] : memref<8x128xf32, #tpu.memory_space<vmem>>, vector<8x128xf32>
      %c0_12 = arith.constant 0 : index
      %c0_13 = arith.constant 0 : index
      %13 = vector.load %arg5[%c0_12, %c0_13] : memref<1x128xf32, #tpu.memory_space<vmem>>, vector<1x128xf32>
      %14 = vector.broadcast %13 : vector<1x128xf32> to vector<8x128xf32>
      %15 = arith.addf %12, %14 : vector<8x128xf32>
      %cst_14 = arith.constant 0.000000e+00 : f32
      %16 = vector.broadcast %cst_14 : f32 to vector<8x128xf32>
      %17 = arith.cmpf oge, %15, %16 : vector<8x128xf32>
      %cst_15 = arith.constant 1.000000e-01 : f32
      %18 = vector.broadcast %cst_15 : f32 to vector<8x128xf32>
      %19 = arith.mulf %18, %15 : vector<8x128xf32>
      %20 = arith.select %17, %15, %19 : vector<8x128xi1>, vector<8x128xf32>
      %c0_16 = arith.constant 0 : index
      %c0_17 = arith.constant 0 : index
      %21 = vector.load %arg6[%c0_16, %c0_17] : memref<8x128xf32, #tpu.memory_space<vmem>>, vector<8x128xf32>
      tpu.vector_store %arg6[%c0_16, %c0_17], %20 {strides = array<i32>} : memref<8x128xf32, #tpu.memory_space<vmem>>, vector<8x128xf32>,
    } else {
    }
    return
  }
  func.func @transform_0(%arg0: i32, %arg1: i32, %arg2: i32) -> (i32, i32) {
    %c0_i32 = arith.constant 0 : i32
    return %arg0, %arg2 : i32, i32
  }
  func.func @transform_1(%arg0: i32, %arg1: i32, %arg2: i32) -> (i32, i32) {
    %c0_i32 = arith.constant 0 : i32
    return %arg1, %arg2 : i32, i32
  }
  func.func @transform_2(%arg0: i32, %arg1: i32, %arg2: i32) -> (i32, i32) {
    %c0_i32 = arith.constant 0 : i32
    %c0_i32_0 = arith.constant 0 : i32
    return %c0_i32, %arg1 : i32, i32
  }
  func.func @transform_3(%arg0: i32, %arg1: i32, %arg2: i32) -> (i32, i32) {
    %c0_i32 = arith.constant 0 : i32
    return %arg0, %arg1 : i32, i32
  }
}

</mosaic_0001>

<bundles_post_ra>
// kernel: tpu_custom_call.1
= control target key start
LH: loop header
LB: loop body
LE: loop exit
PB: predicated region body
PF: predicated region fallthrough
CT: control target
= control target key end

     0   :  { %8 = vsyncpa [#allocation4], 0  ;;  %s399_s0 = inlined_call_operand.hbm [shape: f32[8,128], index: 0, kind: input, shape index: {}]   ;;  %s400_s1 = inlined_call_operand.hbm [shape: f32[128,128], index: 1, kind: input, shape index: {}]   ;;  %s401_s2 = inlined_call_operand.vmem [shape: f32[1,128], index: 2, kind: input, shape index: {}]   ;;  %s402_s3 = inlined_call_operand.hbm [shape: f32[8,128], index: 3, kind: output, shape index: {}]  }
   0x1   :  { %9 = vsyncpa [#allocation7], 0 }
   0x2   :  { %10 = vsyncpa [#allocation5], 0  ;;  %s325_s12 = smov [#allocation3]   ;;  %s326_s14 = smov [#allocation6]  }
   0x3   :  { %s17_s13 = sshll.u32 %s325_s12, 4  ;;  %s26_s15 = sshll.u32 %s326_s14, 4  ;;  %s18_s13 = int_to_ptr.vmem [resolvable:$true] %s17_s13  ;;  %s353_s15 = int_to_ptr.vmem [resolvable:$true] %s26_s15 }
   0x4   :  { %s253_s18 = scalar_lea.hbm %s399_s0, 128 }
   0x5   :  { %p254_p0 = scmp.ne.s32.totalorder %s399_s0, %s253_s18  ;;  %p257_p1 = scmp.lt.u32.totalorder %s253_s18, %s399_s0 }
   0x7   :  { %p259_p2 = pnand %p257_p1, %p254_p0 }
   0x9   :  { %262 = shalt.err (!%p259_p2)
}
   0xa   :  { %s263_s23 = scalar_lea.vmem %s18_s13, 128  ;;  %p268_p4 = scmp.lt.s32.totalorder %s18_s13, %s18_s13 }
   0xb   :  { %p264_p3 = scmp.ne.s32.totalorder %s18_s13, %s263_s23  ;;  %p269_p5 = scmp.lt.s32.totalorder %s263_s23, %s263_s23 }
   0xd   :  { %p270_p6 = por %p269_p5, %p268_p4 }
   0xf   :  { %p271_p7 = pnand %p270_p6, %p264_p3 }
  0x11   :  { %274 = shalt.err (!%p271_p7)
}
  0x12   :  { %20 = dma.hbm_to_vmem [thread:$0]  %s399_s0, 128, %s18_s13, [#allocation4]  }
  0x13   :  { %s275_s28 = scalar_lea.hbm %s400_s1, 2048 }
  0x14   :  { %p276_p8 = scmp.ne.s32.totalorder %s400_s1, %s275_s28  ;;  %p279_p9 = scmp.lt.u32.totalorder %s275_s28, %s400_s1 }
  0x16   :  { %p281_p10 = pnand %p279_p9, %p276_p8 }
  0x18   :  { %284 = shalt.err (!%p281_p10)
}
  0x19   :  { %s285_s6 = scalar_lea.vmem %s353_s15, 2048  ;;  %p290_p12 = scmp.lt.s32.totalorder %s353_s15, %s353_s15 }
  0x1a   :  { %p286_p11 = scmp.ne.s32.totalorder %s353_s15, %s285_s6  ;;  %p291_p13 = scmp.lt.s32.totalorder %s285_s6, %s285_s6 }
  0x1c   :  { %p292_p0 = por %p291_p13, %p290_p12 }
  0x1e   :  { %p293_p1 = pnand %p292_p0, %p286_p11 }
  0x20   :  { %296 = shalt.err (!%p293_p1)
}
  0x21   :  { %s327_s0 = smov 128   ;;  %s328_s7 = smov 8  }
  0x22   :  { %32 = dma.hbm_to_vmem [thread:$0]  %s400_s1, 2048, %s353_s15, [#allocation7], %s327_s0, %s327_s0, %s328_s7  }
  0x23   :  { %319 = dma.done.wait [#allocation4], 128  }
  0x24   :  { %320 = vsyncadd [#allocation4], 4294967168 }
  0x25   :  { %321 = dma.done.wait [#allocation7], 2048  }
  0x26   :  { %322 = vsyncadd [#allocation7], 4294965248  ;;  %v329_v0 = vmov 0.0|0.0   ;;  %vm330_vm0 = vmmov 0   ;;  %v331_v1 = vmov 0.0   ;;  %v48_v2 = vld [vmem:[#allocation6] sm:$0xff] }
  0x27   :  { %221 = vmatprep.subr.bf16.mxu0 %v329_v0  ;;  %218 = vmatprep.mubr.msk.f32.mxu0 %vm330_vm0, %v331_v1  ;;  %v49_v3 = vld [vmem:[#allocation6 + $0x8] sm:$0xff]  ;;  %v50_v5 = vld [vmem:[#allocation6 + $0x10] sm:$0xff]  ;;  %v51_v6 = vld [vmem:[#allocation6 + $0x18] sm:$0xff]  ;;  %s332_s11 = smov [#allocation8]  }
  0x28   :  { %v222_v4 = vpack.c.bf16 %v49_v3, %v48_v2  ;;  %v225_v7 = vpack.c.bf16 %v51_v6, %v50_v5  ;;  %v52_v8 = vld [vmem:[#allocation6 + $0x20] sm:$0xff]  ;;  %v53_v9 = vld [vmem:[#allocation6 + $0x28] sm:$0xff]  ;;  %v54_v11 = vld [vmem:[#allocation6 + $0x30] sm:$0xff]  ;;  %s158_s12 = sshll.u32 %s332_s11, 4  ;;  %s159_s12 = int_to_ptr.vmem [resolvable:$true] %s158_s12 }
  0x29   :  { %v228_v10 = vpack.c.bf16 %v53_v9, %v52_v8  ;;  %v55_v12 = vld [vmem:[#allocation6 + $0x38] sm:$0xff]  ;;  %v56_v14 = vld [vmem:[#allocation6 + $0x40] sm:$0xff]  ;;  %v57_v15 = vld [vmem:[#allocation6 + $0x48] sm:$0xff]  ;;  %s297_s13 = scalar_lea.vmem %s159_s12, 128  ;;  %p302_p3 = scmp.lt.s32.totalorder %s159_s12, %s159_s12 }
  0x2a   :  { %223 = vmatpush3.bf16.xpose.msra.mxu0 %v222_v4  ;;  %v231_v13 = vpack.c.bf16 %v55_v12, %v54_v11  ;;  %v234_v16 = vpack.c.bf16 %v57_v15, %v56_v14  ;;  %v58_v17 = vld [vmem:[#allocation6 + $0x50] sm:$0xff]  ;;  %v59_v18 = vld [vmem:[#allocation6 + $0x58] sm:$0xff]  ;;  %v60_v20 = vld [vmem:[#allocation6 + $0x60] sm:$0xff]  ;;  %p298_p2 = scmp.ne.s32.totalorder %s159_s12, %s297_s13  ;;  %p303_p4 = scmp.lt.s32.totalorder %s297_s13, %s297_s13 }
  0x2b   :  { %224 = vmatprep.subr.bf16.mxu0 %v329_v0  ;;  %v237_v19 = vpack.c.bf16 %v59_v18, %v58_v17  ;;  %v61_v21 = vld [vmem:[#allocation6 + $0x68] sm:$0xff]  ;;  %v62_v23 = vld [vmem:[#allocation6 + $0x70] sm:$0xff]  ;;  %v63_v24 = vld [vmem:[#allocation6 + $0x78] sm:$0xff] }
  0x2c   :  { %v240_v22 = vpack.c.bf16 %v61_v21, %v60_v20  ;;  %v243_v25 = vpack.c.bf16 %v63_v24, %v62_v23  ;;  %v47_v26 = vld [vmem:[#allocation3] sm:$0xff]  ;;  %p304_p5 = por %p303_p4, %p302_p3 }
  0x2d   :  { %v168_v27 = vld [vmem:[%s401_s2] ss:$0 sm:$0xff] }
  0x2e   :  { %p305_p6 = pnand %p304_p5, %p298_p2 }
  0x32   :  { %226 = vmatpush3.bf16.xpose.msra.mxu0 %v225_v7 }
  0x33   :  { %227 = vmatprep.subr.bf16.mxu0 %v329_v0 }
  0x3a   :  { %229 = vmatpush3.bf16.xpose.msra.mxu0 %v228_v10 }
  0x3b   :  { %230 = vmatprep.subr.bf16.mxu0 %v329_v0 }
  0x42   :  { %232 = vmatpush3.bf16.xpose.msra.mxu0 %v231_v13 }
  0x43   :  { %233 = vmatprep.subr.bf16.mxu0 %v329_v0 }
  0x4a   :  { %235 = vmatpush3.bf16.xpose.msra.mxu0 %v234_v16 }
  0x4b   :  { %236 = vmatprep.subr.bf16.mxu0 %v329_v0 }
  0x52   :  { %238 = vmatpush3.bf16.xpose.msra.mxu0 %v237_v19 }
  0x53   :  { %239 = vmatprep.subr.bf16.mxu0 %v329_v0 }
  0x5a   :  { %241 = vmatpush3.bf16.xpose.msra.mxu0 %v240_v22 }
  0x5b   :  { %242 = vmatprep.subr.bf16.mxu0 %v329_v0 }
  0x62   :  { %244 = vmatpush3.bf16.xpose.msra.mxu0 %v243_v25 }
  0x69   :  { %219 = vmatmul.mubr.f32.vlgmr.msra.gmra.mrb[0].mxu0 %v47_v26 }
 0x13c   :  { %v130_v28 = vpop.f32.mrb[0].mxu0 }
 0x13d   :  { %v147_v29 = vadd.f32 %v168_v27, %v130_v28  ;;  %v220_v30 = vpop.f32.mrb[1].mxu0 }
 0x13f   :  { %v149_v31 = vmul.f32 0.1, %v147_v29  ;;  %vm148_vm1 = vcmp.ge.f32.partialorder %v147_v29, 0.0 }
 0x141   :  { %v150_v32 = vsel %vm148_vm1, %v147_v29, %v149_v31 }
 0x142   :  { %151 = vst [vmem:[#allocation8] sm:$0xff] %v150_v32 }
 0x143   :  { %308 = shalt.err (!%p305_p6)
}
 0x144   :  { %s309_s2 = scalar_lea.hbm %s402_s3, 128 }
 0x145   :  { %p310_p7 = scmp.ne.s32.totalorder %s402_s3, %s309_s2  ;;  %p313_p8 = scmp.lt.u32.totalorder %s309_s2, %s402_s3 }
 0x147   :  { %p315_p9 = pnand %p313_p8, %p310_p7 }
 0x149   :  { %318 = shalt.err (!%p315_p9)
}
 0x14a   :  { %161 = dma.vmem_to_hbm [thread:$0]  %s159_s12, 128, %s402_s3, [#allocation5]  }
 0x14b   :  { %323 = dma.done.wait [#allocation5], 128  }
 0x14c   :  { %324 = vsyncadd [#allocation5], 4294967168 }
 0x14d   :  { %165 = vsyncpa [#allocation4], 1 }
 0x14e   :  { %166 = vsyncpa [#allocation7], 1 }
 0x14f   :  { %167 = vsyncpa [#allocation5], 1 }

</bundles_post_ra>
